<compile_context>
chip_gen: v5e
topology: v5e:2x2
jax: 0.10.0
libtpu: 0.0.40
codegen_flags: <defaults>
</compile_context>

<pallas_src>
import functools
from math import sqrt

import jax
import jax.numpy as jnp
from jax.experimental import pallas as pl
from jax.experimental.pallas import tpu as pltpu


def _round_up(x, m):
    return ((x + m - 1) // m) * m


# ----------------------------------------------------------------------------
# Shared gate math (pure jnp; used inside kernels and by the packed reference).
# z: (B, 4*Hp) f32, gate slabs are 128-lane aligned; c_prev: (B, Hp) f32.
# ----------------------------------------------------------------------------
def _lstm_gates(z, c_prev, hp):
    i_g = jax.nn.sigmoid(z[:, 0 * hp:1 * hp])
    f_g = jax.nn.sigmoid(z[:, 1 * hp:2 * hp])
    o_g = jax.nn.sigmoid(z[:, 2 * hp:3 * hp])
    c_g = jnp.tanh(z[:, 3 * hp:4 * hp])
    # F.threshold(o, threshold=0.4, value=0): keep o where o > 0.4, else 0.
    o_g = jnp.where(o_g > 0.4, o_g, 0.0)
    c_new = f_g * c_prev + i_g * c_g
    h_new = o_g * jnp.tanh(c_new)
    return h_new, c_new


# ----------------------------------------------------------------------------
# Parameter packing (done once, outside the hot path).
#   Wi/Wf/Wo/Wc: (input_size + H, H), rows [0:H] multiply h_fore (torch.cat
#   order is [h_fore, x]), rows [H:] multiply x.  Per-gate columns are padded
#   to Hp = round_up(H, 128) so each gate occupies its own lane-aligned slab.
# ----------------------------------------------------------------------------
def pack_lstm_params(Wi, Wf, Wo, Wc, Bi, Bf, Bo, Bc, *, matmul_dtype=jnp.float32):
    dim_param, H = Wi.shape
    input_size = dim_param - H
    Hp = _round_up(H, 128)

    def pad_cols(w):
        return jnp.pad(w, ((0, 0), (0, Hp - H)))

    wh_slabs, wx_slabs, b_slabs = [], [], []
    for W, Bb in ((Wi, Bi), (Wf, Bf), (Wo, Bo), (Wc, Bc)):
        wh_slabs.append(pad_cols(W[:H, :]))          # hidden rows
        wx_slabs.append(pad_cols(W[H:, :]))          # input rows
        b_slabs.append(jnp.pad(Bb, (0, Hp - H)))

    wh = jnp.concatenate(wh_slabs, axis=-1)          # (H, 4*Hp)
    wh = jnp.pad(wh, ((0, Hp - H), (0, 0)))          # (Hp, 4*Hp), padded rows = 0
    wx = jnp.concatenate(wx_slabs, axis=-1)          # (input_size, 4*Hp)
    b = jnp.concatenate(b_slabs, axis=-1).reshape(1, 4 * Hp).astype(jnp.float32)

    return dict(
        wh=wh.astype(matmul_dtype),
        wx=wx.astype(matmul_dtype),
        b=b,                                          # bias kept f32 (post-accum add)
        hidden_size=H,
        hp=Hp,
        input_size=input_size,
    )


def _pad_state(a, H, Hp):
    return a if Hp == H else jnp.pad(a, ((0, 0), (0, Hp - H)))


# ----------------------------------------------------------------------------
# Single-step kernel (module-faithful forward).  Grid-less pallas_call: every
# ref is the whole array resident in VMEM.  h and c are packed into one
# lane-dense (2, B, Hp) output.
# ----------------------------------------------------------------------------
def _lstm_cell_kernel(x_ref, h_ref, c_ref, wh_ref, wx_ref, b_ref, hc_ref, *, hp):
    wdt = wh_ref.dtype
    z = (jnp.dot(h_ref[...].astype(wdt), wh_ref[...],
                 preferred_element_type=jnp.float32)
         + jnp.dot(x_ref[...].astype(wdt), wx_ref[...],
                   preferred_element_type=jnp.float32)
         + b_ref[...])
    h_new, c_new = _lstm_gates(z, c_ref[...].astype(jnp.float32), hp)
    hc_ref[0] = h_new.astype(hc_ref.dtype)
    hc_ref[1] = c_new.astype(hc_ref.dtype)


def lstm_cell_forward(x, h_fore, c_fore, params):
    """Pallas-backed LstmCell.forward.  Returns (h, c), shapes (B, H)."""
    H, Hp = params["hidden_size"], params["hp"]
    B = x.shape[0]
    h_in = _pad_state(h_fore, H, Hp)
    c_in = _pad_state(c_fore, H, Hp)

    hc = pl.pallas_call(
        functools.partial(_lstm_cell_kernel, hp=Hp),
        out_shape=jax.ShapeDtypeStruct((2, B, Hp), x.dtype),
        in_specs=[pl.BlockSpec(memory_space=pltpu.MemorySpace.VMEM)] * 6,
        out_specs=pl.BlockSpec(memory_space=pltpu.MemorySpace.VMEM),
    )(x, h_in, c_in, params["wh"], params["wx"], params["b"])

    return hc[0, :, :H], hc[1, :, :H]


# ----------------------------------------------------------------------------
# Sequence-fused kernel: one pallas_call over T timesteps.
#   * x_t @ W_x (+ b) is precomputed for all t as one big matmul (no serial dep).
#   * W_h stays resident in VMEM across the whole grid (index_map -> (0,0)).
#   * h/c are carried in VMEM scratch; only z_x[t] is DMA'd in and h_t out.
# ----------------------------------------------------------------------------
def _lstm_seq_kernel(h0_ref, c0_ref, wh_ref, zx_ref,
                     h_seq_ref, c_last_ref, h_sc, c_sc, *, hp):
    t = pl.program_id(0)

    @pl.when(t == 0)
    def _():
        h_sc[...] = h0_ref[...].astype(jnp.float32)
        c_sc[...] = c0_ref[...].astype(jnp.float32)

    wdt = wh_ref.dtype
    z = (jnp.dot(h_sc[...].astype(wdt), wh_ref[...],
                 preferred_element_type=jnp.float32)
         + zx_ref[0])
    h_new, c_new = _lstm_gates(z, c_sc[...], hp)

    h_sc[...] = h_new
    c_sc[...] = c_new
    h_seq_ref[0] = h_new.astype(h_seq_ref.dtype)
    c_last_ref[...] = c_new.astype(c_last_ref.dtype)   # output-resident accumulator


def lstm_sequence_forward(x_seq, h0, c0, params):
    """Run the LstmCell over a (T, B, input_size) sequence in one kernel.

    Returns (h_seq (T, B, H), c_last (B, H))."""
    wh, wx, b = params["wh"], params["wx"], params["b"]
    H, Hp = params["hidden_size"], params["hp"]
    T, B, I = x_seq.shape
    wdt = wh.dtype

    # Hoist the input projection out of the recurrence: one MXU-shaped matmul.
    zx = jnp.dot(x_seq.reshape(T * B, I).astype(wdt), wx,
                 preferred_element_type=jnp.float32) + b
    zx = zx.reshape(T, B, 4 * Hp)

    h_in = _pad_state(h0, H, Hp)
    c_in = _pad_state(c0, H, Hp)

    h_seq, c_last = pl.pallas_call(
        functools.partial(_lstm_seq_kernel, hp=Hp),
        out_shape=(
            jax.ShapeDtypeStruct((T, B, Hp), x_seq.dtype),
            jax.ShapeDtypeStruct((B, Hp), x_seq.dtype),
        ),
        grid_spec=pltpu.PrefetchScalarGridSpec(
            num_scalar_prefetch=0,
            grid=(T,),
            in_specs=[
                pl.BlockSpec((B, Hp), lambda t: (0, 0)),            # h0
                pl.BlockSpec((B, Hp), lambda t: (0, 0)),            # c0
                pl.BlockSpec((Hp, 4 * Hp), lambda t: (0, 0)),       # W_h (VMEM-resident)
                pl.BlockSpec((1, B, 4 * Hp), lambda t: (t, 0, 0)),  # z_x for step t
            ],
            out_specs=[
                pl.BlockSpec((1, B, Hp), lambda t: (t, 0, 0)),      # h_t
                pl.BlockSpec((B, Hp), lambda t: (0, 0)),            # final c (resident)
            ],
            scratch_shapes=[
                pltpu.VMEM((B, Hp), jnp.float32),                   # h carry
                pltpu.VMEM((B, Hp), jnp.float32),                   # c carry
            ],
        ),
        compiler_params=pltpu.CompilerParams(
            dimension_semantics=("arbitrary",)),                    # serial recurrence
    )(h_in, c_in, wh, zx)

    return h_seq[:, :, :H], c_last[:, :H]


# ----------------------------------------------------------------------------
# Pure-JAX references.
# ----------------------------------------------------------------------------
def lstm_cell_reference(x, h_fore, c_fore, Wi, Wf, Wo, Wc, Bi, Bf, Bo, Bc):
    """Module-faithful reference.  Also returns pre-threshold o gate."""
    hi = jax.lax.Precision.HIGHEST
    inp = jnp.concatenate([h_fore, x], axis=-1)
    i = jax.nn.sigmoid(jnp.dot(inp, Wi, precision=hi) + Bi)
    f = jax.nn.sigmoid(jnp.dot(inp, Wf, precision=hi) + Bf)
    o = jax.nn.sigmoid(jnp.dot(inp, Wo, precision=hi) + Bo)
    g = jnp.tanh(jnp.dot(inp, Wc, precision=hi) + Bc)
    o_thr = jnp.where(o > 0.4, o, 0.0)
    c = f * c_fore + i * g
    h = o_thr * jnp.tanh(c)
    return h, c, o


def lstm_cell_packed_reference(x, h_fore, c_fore, params):
    """Reference mirroring the packed/low-precision kernel arithmetic."""
    wh, wx, b = params["wh"], params["wx"], params["b"]
    H, Hp = params["hidden_size"], params["hp"]
    wdt = wh.dtype
    h_in = _pad_state(h_fore, H, Hp)
    c_in = _pad_state(c_fore, H, Hp)
    z = (jnp.dot(h_in.astype(wdt), wh, preferred_element_type=jnp.float32)
         + jnp.dot(x.astype(wdt), wx, preferred_element_type=jnp.float32)
         + b)
    h, c = _lstm_gates(z, c_in, Hp)
    return h[:, :H], c[:, :H]


# ----------------------------------------------------------------------------
# Test helpers (robust to elements sitting exactly on the F.threshold boundary).
# ----------------------------------------------------------------------------
def _check_close(name, got, want, atol):
    err = float(jnp.max(jnp.abs(got.astype(jnp.float32) - want.astype(jnp.float32))))
    assert err <= atol, f"{name}: max abs err {err} > {atol}"


def _check_h(name, got, want, o_pre, atol):
    ok = (jnp.abs(got.astype(jnp.float32) - want) <= atol) | (jnp.abs(o_pre - 0.4) < 1e-4)
    assert bool(jnp.all(ok)), f"{name}: mismatch beyond tolerance"


if __name__ == "__main__":
    B, input_size, hidden_size, T = 8, 32, 32, 6

    key = jax.random.PRNGKey(0)
    keys = jax.random.split(key, 8)
    u = 1.0 / sqrt(hidden_size)
    dim_param = input_size + hidden_size

    Wi, Wf, Wo, Wc = [
        jax.random.uniform(k, (dim_param, hidden_size), jnp.float32, -u, u)
        for k in keys[:4]
    ]
    Bi = Bf = Bo = Bc = jnp.zeros((hidden_size,), jnp.float32)

    x = jax.random.normal(keys[4], (B, input_size), jnp.float32)
    h0 = jax.random.normal(keys[5], (B, hidden_size), jnp.float32)
    c0 = jax.random.normal(keys[6], (B, hidden_size), jnp.float32)
    x_seq = jax.random.normal(keys[7], (T, B, input_size), jnp.float32)

    # ---- f32 weights: single-step cell -------------------------------------
    params = pack_lstm_params(Wi, Wf, Wo, Wc, Bi, Bf, Bo, Bc,
                              matmul_dtype=jnp.float32)
    h, c = lstm_cell_forward(x, h0, c0, params)
    jax.block_until_ready((h, c))

    h_ref, c_ref, o_ref = lstm_cell_reference(x, h0, c0, Wi, Wf, Wo, Wc, Bi, Bf, Bo, Bc)
    _check_close("cell.c", c, c_ref, 2e-4)
    _check_h("cell.h", h, h_ref, o_ref, 2e-4)

    # ---- f32 weights: fused sequence recurrence ----------------------------
    h_seq, c_last = lstm_sequence_forward(x_seq, h0, c0, params)
    jax.block_until_ready((h_seq, c_last))

    hr, cr = h0, c0
    for t in range(T):
        hr, cr, o_r = lstm_cell_reference(x_seq[t], hr, cr,
                                          Wi, Wf, Wo, Wc, Bi, Bf, Bo, Bc)
        _check_h(f"seq.h[{t}]", h_seq[t], hr, o_r, 2e-4)
    _check_close("seq.c_last", c_last, cr, 2e-4)

    # ---- bf16 weights (halved weight DMA; f32 accumulation + gate math) ----
    params_bf16 = pack_lstm_params(Wi, Wf, Wo, Wc, Bi, Bf, Bo, Bc,
                                   matmul_dtype=jnp.bfloat16)
    h16, c16 = lstm_cell_forward(x, h0, c0, params_bf16)
    jax.block_until_ready((h16, c16))
    hm, cm = lstm_cell_packed_reference(x, h0, c0, params_bf16)
    assert bool(jnp.all(jnp.isfinite(h16))) and bool(jnp.all(jnp.isfinite(c16)))
    _check_close("cell.c(bf16)", c16, cm, 1e-2)

    print("KERNEL_OK")
</pallas_src>

<mosaic_0001>
module attributes {stable_mosaic.version = 11 : i64} {
  func.func @_lstm_cell_kernel(%arg0: memref<8x32xf32, #tpu.memory_space<vmem>>, %arg1: memref<8x128xf32, #tpu.memory_space<vmem>>, %arg2: memref<8x128xf32, #tpu.memory_space<vmem>>, %arg3: memref<128x512xf32, #tpu.memory_space<vmem>>, %arg4: memref<32x512xf32, #tpu.memory_space<vmem>>, %arg5: memref<1x512xf32, #tpu.memory_space<vmem>>, %arg6: memref<2x8x128xf32, #tpu.memory_space<vmem>>) attributes {dimension_semantics = [], scalar_prefetch = 0 : i64, scratch_operands = 0 : i64, tpu.core_type = #tpu.core_type<tc>} {
    %c0 = arith.constant 0 : index
    %c0_0 = arith.constant 0 : index
    %0 = vector.load %arg1[%c0, %c0_0] : memref<8x128xf32, #tpu.memory_space<vmem>>, vector<8x128xf32>
    %c0_1 = arith.constant 0 : index
    %c0_2 = arith.constant 0 : index
    %1 = vector.load %arg3[%c0_1, %c0_2] : memref<128x512xf32, #tpu.memory_space<vmem>>, vector<128x512xf32>
    %cst = arith.constant dense<0.000000e+00> : vector<8x512xf32>
    %2 = tpu.matmul %0, %1, %cst {dimension_numbers = #tpu.dot_dimension_numbers<[1], [0], [0], [1], [0, 0, 1, 1], [], []>} : vector<8x128xf32>, vector<128x512xf32>, vector<8x512xf32> -> vector<8x512xf32>
    %c0_3 = arith.constant 0 : index
    %c0_4 = arith.constant 0 : index
    %3 = vector.load %arg0[%c0_3, %c0_4] : memref<8x32xf32, #tpu.memory_space<vmem>>, vector<8x32xf32>
    %c0_5 = arith.constant 0 : index
    %c0_6 = arith.constant 0 : index
    %4 = vector.load %arg4[%c0_5, %c0_6] : memref<32x512xf32, #tpu.memory_space<vmem>>, vector<32x512xf32>
    %cst_7 = arith.constant dense<0.000000e+00> : vector<8x512xf32>
    %5 = tpu.matmul %3, %4, %cst_7 {dimension_numbers = #tpu.dot_dimension_numbers<[1], [0], [0], [1], [0, 0, 1, 1], [], []>} : vector<8x32xf32>, vector<32x512xf32>, vector<8x512xf32> -> vector<8x512xf32>
    %6 = arith.addf %2, %5 : vector<8x512xf32>
    %c0_8 = arith.constant 0 : index
    %c0_9 = arith.constant 0 : index
    %7 = vector.load %arg5[%c0_8, %c0_9] : memref<1x512xf32, #tpu.memory_space<vmem>>, vector<1x512xf32>
    %8 = vector.broadcast %7 : vector<1x512xf32> to vector<8x512xf32>
    %9 = arith.addf %6, %8 : vector<8x512xf32>
    %c0_10 = arith.constant 0 : index
    %c0_11 = arith.constant 0 : index
    %10 = vector.load %arg2[%c0_10, %c0_11] : memref<8x128xf32, #tpu.memory_space<vmem>>, vector<8x128xf32>
    %11 = vector.extract_strided_slice %9 {offsets = [0, 0], sizes = [8, 128], strides = [1, 1]} : vector<8x512xf32> to vector<8x128xf32>
    %12 = arith.negf %11 : vector<8x128xf32>
    %13 = math.exp %12 : vector<8x128xf32>
    %cst_12 = arith.constant 1.000000e+00 : f32
    %14 = vector.broadcast %cst_12 : f32 to vector<8x128xf32>
    %15 = arith.addf %14, %13 : vector<8x128xf32>
    %16 = arith.divf %14, %15 : vector<8x128xf32>
    %17 = vector.extract_strided_slice %9 {offsets = [0, 128], sizes = [8, 128], strides = [1, 1]} : vector<8x512xf32> to vector<8x128xf32>
    %18 = arith.negf %17 : vector<8x128xf32>
    %19 = math.exp %18 : vector<8x128xf32>
    %cst_13 = arith.constant 1.000000e+00 : f32
    %20 = vector.broadcast %cst_13 : f32 to vector<8x128xf32>
    %21 = arith.addf %20, %19 : vector<8x128xf32>
    %22 = arith.divf %20, %21 : vector<8x128xf32>
    %23 = vector.extract_strided_slice %9 {offsets = [0, 256], sizes = [8, 128], strides = [1, 1]} : vector<8x512xf32> to vector<8x128xf32>
    %24 = arith.negf %23 : vector<8x128xf32>
    %25 = math.exp %24 : vector<8x128xf32>
    %cst_14 = arith.constant 1.000000e+00 : f32
    %26 = vector.broadcast %cst_14 : f32 to vector<8x128xf32>
    %27 = arith.addf %26, %25 : vector<8x128xf32>
    %28 = arith.divf %26, %27 : vector<8x128xf32>
    %29 = vector.extract_strided_slice %9 {offsets = [0, 384], sizes = [8, 128], strides = [1, 1]} : vector<8x512xf32> to vector<8x128xf32>
    %30 = math.tanh %29 : vector<8x128xf32>
    %cst_15 = arith.constant 4.000000e-01 : f32
    %31 = vector.broadcast %cst_15 : f32 to vector<8x128xf32>
    %32 = arith.cmpf ogt, %28, %31 : vector<8x128xf32>
    %cst_16 = arith.constant 0.000000e+00 : f32
    %33 = vector.broadcast %cst_16 : f32 to vector<8x128xf32>
    %34 = arith.select %32, %28, %33 : vector<8x128xi1>, vector<8x128xf32>
    %35 = arith.mulf %22, %10 : vector<8x128xf32>
    %36 = arith.mulf %16, %30 : vector<8x128xf32>
    %37 = arith.addf %35, %36 : vector<8x128xf32>
    %38 = math.tanh %37 : vector<8x128xf32>
    %39 = arith.mulf %34, %38 : vector<8x128xf32>
    %c0_17 = arith.constant 0 : index
    %c0_18 = arith.constant 0 : index
    %c0_19 = arith.constant 0 : index
    %40 = vector.load %arg6[%c0_17, %c0_18, %c0_19] : memref<2x8x128xf32, #tpu.memory_space<vmem>>, vector<1x8x128xf32>
    %41 = vector.shape_cast %40 : vector<1x8x128xf32> to vector<8x128xf32>
    %42 = vector.shape_cast %39 : vector<8x128xf32> to vector<1x8x128xf32>
    tpu.vector_store %arg6[%c0_17, %c0_18, %c0_19], %42 {strides = array<i32>} : memref<2x8x128xf32, #tpu.memory_space<vmem>>, vector<1x8x128xf32>,
    %c1 = arith.constant 1 : index
    %c0_20 = arith.constant 0 : index
    %c0_21 = arith.constant 0 : index
    %43 = vector.load %arg6[%c1, %c0_20, %c0_21] : memref<2x8x128xf32, #tpu.memory_space<vmem>>, vector<1x8x128xf32>
    %44 = vector.shape_cast %43 : vector<1x8x128xf32> to vector<8x128xf32>
    %45 = vector.shape_cast %37 : vector<8x128xf32> to vector<1x8x128xf32>
    tpu.vector_store %arg6[%c1, %c0_20, %c0_21], %45 {strides = array<i32>} : memref<2x8x128xf32, #tpu.memory_space<vmem>>, vector<1x8x128xf32>,
    return
  }
}

</mosaic_0001>

<bundles_post_ra>
// kernel: tpu_custom_call.1
= control target key start
LH: loop header
LB: loop body
LE: loop exit
PB: predicated region body
PF: predicated region fallthrough
CT: control target
= control target key end

     0   :  { %11 = vsyncpa [#allocation3], 0  ;;  %s701_s0 = inlined_call_operand.hbm [shape: f32[8,32], index: 0, kind: input, shape index: {}]   ;;  %s702_s1 = inlined_call_operand.hbm [shape: f32[8,128], index: 1, kind: input, shape index: {}]   ;;  %s703_s2 = inlined_call_operand.hbm [shape: f32[8,128], index: 2, kind: input, shape index: {}]   ;;  %s704_s3 = inlined_call_operand.hbm [shape: f32[128,512], index: 3, kind: input, shape index: {}]   ;;  %s705_s4 = inlined_call_operand.hbm [shape: f32[32,512], index: 4, kind: input, shape index: {}]   ;;  %s706_s5 = inlined_call_operand.vmem [shape: f32[1,512], index: 5, kind: input, shape index: {}]   ;;  %s707_s6 = inlined_call_operand.hbm [shape: f32[2,8,128], index: 6, kind: output, shape index: {}]  }
   0x1   :  { %12 = vsyncpa [#allocation6], 0 }
   0x2   :  { %13 = vsyncpa [#allocation9], 0  ;;  %s31_s23 = sshll.u32 %s702_s1, 4  ;;  %s32_s23 = int_to_ptr.hbm [resolvable:$true] %s31_s23 }
   0x3   :  { %14 = vsyncpa [#allocation4], 0  ;;  %s631_s24 = smov [#allocation5]   ;;  %s52_s28 = sshll.u32 %s704_s3, 4  ;;  %s53_s28 = int_to_ptr.hbm [resolvable:$true] %s52_s28 }
   0x4   :  { %s33_s25 = sshll.u32 %s631_s24, 4  ;;  %s632_s29 = smov [#allocation8]   ;;  %s34_s25 = int_to_ptr.vmem [resolvable:$true] %s33_s25 }
   0x5   :  { %36 = dma.hbm_to_vmem [thread:$0]  %s32_s23, 128, %s34_s25, [#allocation6]  }
   0x6   :  { %s54_s30 = sshll.u32 %s632_s29, 4  ;;  %s633_s7 = smov 512   ;;  %s55_s30 = int_to_ptr.vmem [resolvable:$true] %s54_s30 }
   0x7   :  { %s634_s8 = smov 32   ;;  %s20_s1 = sshll.u32 %s701_s0, 4  ;;  %s21_s1 = int_to_ptr.hbm [resolvable:$true] %s20_s1 }
   0x8   :  { %60 = dma.hbm_to_vmem [thread:$0]  %s53_s28, 8192, %s55_s30, [#allocation9], %s633_s7, %s633_s7, %s634_s8  }
   0x9   :  { %s635_s11 = smov [#allocation2]   ;;  %s42_s3 = sshll.u32 %s703_s2, 4  ;;  %s43_s3 = int_to_ptr.hbm [resolvable:$true] %s42_s3 }
   0xa   :  { %s22_s12 = sshll.u32 %s635_s11, 4  ;;  %s636_s15 = smov [#allocation7]   ;;  %s23_s12 = int_to_ptr.vmem [resolvable:$true] %s22_s12 }
   0xb   :  { %25 = dma.hbm_to_vmem [thread:$0]  %s21_s1, 128, %s23_s12, [#allocation3]  }
   0xc   :  { %s44_s16 = sshll.u32 %s636_s15, 4  ;;  %s65_s19 = sshll.u32 %s705_s4, 4  ;;  %s45_s16 = int_to_ptr.vmem [resolvable:$true] %s44_s16  ;;  %s66_s19 = int_to_ptr.hbm [resolvable:$true] %s65_s19 }
   0xd   :  { %47 = dma.hbm_to_vmem [thread:$0]  %s43_s3, 128, %s45_s16, [#allocation6]  }
   0xe   :  { %s637_s0 = smov [#allocation10]  }
   0xf   :  { %s67_s20 = sshll.u32 %s637_s0, 4  ;;  %s68_s20 = int_to_ptr.vmem [resolvable:$true] %s67_s20 }
  0x10   :  { %73 = dma.hbm_to_vmem [thread:$0]  %s66_s19, 2048, %s68_s20, [#allocation9], %s633_s7, %s633_s7, %s634_s8  }
  0x11   :  { %623 = dma.done.wait [#allocation3], 128  }
  0x12   :  { %624 = vsyncadd [#allocation3], 4294967168 }
  0x13   :  { %625 = dma.done.wait [#allocation6], 256  }
  0x14   :  { %626 = vsyncadd [#allocation6], 4294967040 }
  0x15   :  { %627 = dma.done.wait [#allocation9], 10240  }
  0x16   :  { %628 = vsyncadd [#allocation9], 4294957056  ;;  %v174_v0 = vld [vmem:[#allocation10 + $0x60] sm:$0xff]  ;;  %v175_v1 = vld [vmem:[#allocation10 + $0x68] sm:$0xff]  ;;  %vm178_vm0 = vcmask 261120   ;;  %s431_s24 = sshll.u32 %s707_s6, 4  ;;  %s432_s24 = int_to_ptr.hbm [resolvable:$true] %s431_s24 }
  0x17   :  { %v176_v2 = vld [vmem:[#allocation10 + $0x70] sm:$0xff]  ;;  %194 = vmatpush.msra.mxu0 %v174_v0  ;;  %214 = vmatpush.msra.mxu1 %v175_v1  ;;  %v170_v3 = vld [vmem:[#allocation10 + $0x40] sm:$0xff]  ;;  %v171_v4 = vld [vmem:[#allocation10 + $0x48] sm:$0xff]  ;;  %s639_s25 = smov 128   ;;  %s640_s26 = smov 8  }
  0x18   :  { %v172_v5 = vld [vmem:[#allocation10 + $0x50] sm:$0xff]  ;;  %234 = vmatpush.msra.mxu2 %v176_v2  ;;  %v166_v6 = vld [vmem:[#allocation10 + $0x20] sm:$0xff]  ;;  %v167_v7 = vld [vmem:[#allocation10 + $0x28] sm:$0xff] }
  0x19   :  { %195 = vmatpush.msra.mxu0 %v170_v3  ;;  %215 = vmatpush.msra.mxu1 %v171_v4  ;;  %v168_v8 = vld [vmem:[#allocation10 + $0x30] sm:$0xff]  ;;  %v162_v9 = vld [vmem:[#allocation10] sm:$0xff]  ;;  %v163_v10 = vld [vmem:[#allocation10 + $0x8] sm:$0xff] }
  0x1a   :  { %235 = vmatpush.msra.mxu2 %v172_v5  ;;  %v177_v11 = vld [vmem:[#allocation10 + $0x78] sm:$0xff]  ;;  %v164_v12 = vld [vmem:[#allocation10 + $0x10] sm:$0xff]  ;;  %v157_v13 = vld [vmem:[#allocation8 + $0x1e0] sm:$0xff] }
  0x1b   :  { %196 = vmatpush.msra.mxu0 %v166_v6  ;;  %216 = vmatpush.msra.mxu1 %v167_v7  ;;  %v158_v14 = vld [vmem:[#allocation8 + $0x1e8] sm:$0xff]  ;;  %v159_v15 = vld [vmem:[#allocation8 + $0x1f0] sm:$0xff]  ;;  %v173_v16 = vld [vmem:[#allocation10 + $0x58] sm:$0xff] }
  0x1c   :  { %236 = vmatpush.msra.mxu2 %v168_v8  ;;  %254 = vmatpush.msra.mxu3 %v177_v11  ;;  %v153_v17 = vld [vmem:[#allocation8 + $0x1c0] sm:$0xff]  ;;  %v154_v18 = vld [vmem:[#allocation8 + $0x1c8] sm:$0xff]  ;;  %v155_v19 = vld [vmem:[#allocation8 + $0x1d0] sm:$0xff] }
  0x1d   :  { %197 = vmatpush.msra.mxu0 %v162_v9  ;;  %217 = vmatpush.msra.mxu1 %v163_v10  ;;  %v169_v20 = vld [vmem:[#allocation10 + $0x38] sm:$0xff]  ;;  %v149_v21 = vld [vmem:[#allocation8 + $0x1a0] sm:$0xff]  ;;  %v150_v22 = vld [vmem:[#allocation8 + $0x1a8] sm:$0xff] }
  0x1e   :  { %237 = vmatpush.msra.mxu2 %v164_v12  ;;  %255 = vmatpush.msra.mxu3 %v173_v16  ;;  %v151_v23 = vld [vmem:[#allocation8 + $0x1b0] sm:$0xff]  ;;  %v165_v24 = vld [vmem:[#allocation10 + $0x18] sm:$0xff]  ;;  %v145_v25 = vld [vmem:[#allocation8 + $0x180] sm:$0xff] }
  0x1f   :  { %262 = vmatpush.msrb.mxu0 %v157_v13  ;;  %282 = vmatpush.msrb.mxu1 %v158_v14  ;;  %v146_v26 = vld [vmem:[#allocation8 + $0x188] sm:$0xff]  ;;  %v147_v27 = vld [vmem:[#allocation8 + $0x190] sm:$0xff]  ;;  %v160_v28 = vld [vmem:[#allocation8 + $0x1f8] sm:$0xff] }
  0x20   :  { %302 = vmatpush.msrb.mxu2 %v159_v15  ;;  %256 = vmatpush.msra.mxu3 %v169_v20  ;;  %v141_v29 = vld [vmem:[#allocation8 + $0x160] sm:$0xff]  ;;  %v142_v30 = vld [vmem:[#allocation8 + $0x168] sm:$0xff]  ;;  %v143_v31 = vld [vmem:[#allocation8 + $0x170] sm:$0xff] }
  0x21   :  { %263 = vmatpush.msrb.mxu0 %v153_v17  ;;  %283 = vmatpush.msrb.mxu1 %v154_v18  ;;  %v156_v32 = vld [vmem:[#allocation8 + $0x1d8] sm:$0xff]  ;;  %v137_v33 = vld [vmem:[#allocation8 + $0x140] sm:$0xff]  ;;  %v138_v34 = vld [vmem:[#allocation8 + $0x148] sm:$0xff] }
  0x22   :  { %303 = vmatpush.msrb.mxu2 %v155_v19  ;;  %257 = vmatpush.msra.mxu3 %v165_v24  ;;  %v139_v35 = vld [vmem:[#allocation8 + $0x150] sm:$0xff]  ;;  %v152_v36 = vld [vmem:[#allocation8 + $0x1b8] sm:$0xff]  ;;  %v133_v37 = vld [vmem:[#allocation8 + $0x120] sm:$0xff] }
  0x23   :  { %264 = vmatpush.msrb.mxu0 %v149_v21  ;;  %284 = vmatpush.msrb.mxu1 %v150_v22  ;;  %v134_v38 = vld [vmem:[#allocation8 + $0x128] sm:$0xff]  ;;  %v135_v39 = vld [vmem:[#allocation8 + $0x130] sm:$0xff]  ;;  %v148_v40 = vld [vmem:[#allocation8 + $0x198] sm:$0xff] }
  0x24   :  { %304 = vmatpush.msrb.mxu2 %v151_v23  ;;  %322 = vmatpush.msrb.mxu3 %v160_v28  ;;  %v129_v41 = vld [vmem:[#allocation8 + $0x100] sm:$0xff]  ;;  %v130_v42 = vld [vmem:[#allocation8 + $0x108] sm:$0xff]  ;;  %v131_v43 = vld [vmem:[#allocation8 + $0x110] sm:$0xff] }
  0x25   :  { %265 = vmatpush.msrb.mxu0 %v145_v25  ;;  %285 = vmatpush.msrb.mxu1 %v146_v26  ;;  %v144_v44 = vld [vmem:[#allocation8 + $0x178] sm:$0xff]  ;;  %v125_v45 = vld [vmem:[#allocation8 + $0xe0] sm:$0xff]  ;;  %v126_v46 = vld [vmem:[#allocation8 + $0xe8] sm:$0xff] }
  0x26   :  { %305 = vmatpush.msrb.mxu2 %v147_v27  ;;  %323 = vmatpush.msrb.mxu3 %v156_v32  ;;  %v127_v47 = vld [vmem:[#allocation8 + $0xf0] sm:$0xff]  ;;  %v140_v48 = vld [vmem:[#allocation8 + $0x158] sm:$0xff]  ;;  %v121_v49 = vld [vmem:[#allocation8 + $0xc0] sm:$0xff] }
  0x27   :  { %266 = vmatpush.msrb.mxu0 %v141_v29  ;;  %286 = vmatpush.msrb.mxu1 %v142_v30  ;;  %v122_v50 = vld [vmem:[#allocation8 + $0xc8] sm:$0xff]  ;;  %v123_v51 = vld [vmem:[#allocation8 + $0xd0] sm:$0xff]  ;;  %v136_v52 = vld [vmem:[#allocation8 + $0x138] sm:$0xff] }
  0x28   :  { %306 = vmatpush.msrb.mxu2 %v143_v31  ;;  %324 = vmatpush.msrb.mxu3 %v152_v36  ;;  %v117_v53 = vld [vmem:[#allocation8 + $0xa0] sm:$0xff]  ;;  %v118_v54 = vld [vmem:[#allocation8 + $0xa8] sm:$0xff]  ;;  %v119_v55 = vld [vmem:[#allocation8 + $0xb0] sm:$0xff] }
  0x29   :  { %267 = vmatpush.msrb.mxu0 %v137_v33  ;;  %287 = vmatpush.msrb.mxu1 %v138_v34  ;;  %v132_v56 = vld [vmem:[#allocation8 + $0x118] sm:$0xff]  ;;  %v113_v57 = vld [vmem:[#allocation8 + $0x80] sm:$0xff]  ;;  %v114_v58 = vld [vmem:[#allocation8 + $0x88] sm:$0xff] }
  0x2a   :  { %307 = vmatpush.msrb.mxu2 %v139_v35  ;;  %325 = vmatpush.msrb.mxu3 %v148_v40  ;;  %v115_v59 = vld [vmem:[#allocation8 + $0x90] sm:$0xff]  ;;  %v161_v60 = vld [vmem:[#allocation2] sm:$0xff]  ;;  %v128_v61 = vld [vmem:[#allocation8 + $0xf8] sm:$0xff] }
  0x2b   :  { %268 = vmatpush.msrb.mxu0 %v133_v37  ;;  %288 = vmatpush.msrb.mxu1 %v134_v38  ;;  %v109_v62 = vld [vmem:[#allocation8 + $0x60] sm:$0xff]  ;;  %v110_v63 = vld [vmem:[#allocation8 + $0x68] sm:$0xff]  ;;  %v111_v0 = vld [vmem:[#allocation8 + $0x70] sm:$0xff] }
  0x2c   :  { %308 = vmatpush.msrb.mxu2 %v135_v39  ;;  %326 = vmatpush.msrb.mxu3 %v144_v44  ;;  %v124_v1 = vld [vmem:[#allocation8 + $0xd8] sm:$0xff]  ;;  %v105_v2 = vld [vmem:[#allocation8 + $0x40] sm:$0xff]  ;;  %v106_v3 = vld [vmem:[#allocation8 + $0x48] sm:$0xff] }
  0x2d   :  { %269 = vmatpush.msrb.mxu0 %v129_v41  ;;  %289 = vmatpush.msrb.mxu1 %v130_v42  ;;  %v107_v4 = vld [vmem:[#allocation8 + $0x50] sm:$0xff]  ;;  %v120_v5 = vld [vmem:[#allocation8 + $0xb8] sm:$0xff]  ;;  %v101_v6 = vld [vmem:[#allocation8 + $0x20] sm:$0xff] }
  0x2e   :  { %309 = vmatpush.msrb.mxu2 %v131_v43  ;;  %327 = vmatpush.msrb.mxu3 %v140_v48  ;;  %v102_v7 = vld [vmem:[#allocation8 + $0x28] sm:$0xff]  ;;  %v103_v8 = vld [vmem:[#allocation8 + $0x30] sm:$0xff]  ;;  %v116_v9 = vld [vmem:[#allocation8 + $0x98] sm:$0xff] }
  0x2f   :  { %270 = vmatpush.msrb.mxu0 %v125_v45  ;;  %290 = vmatpush.msrb.mxu1 %v126_v46  ;;  %v97_v10 = vld [vmem:[#allocation8] sm:$0xff]  ;;  %v98_v11 = vld [vmem:[#allocation8 + $0x8] sm:$0xff]  ;;  %v99_v12 = vld [vmem:[#allocation8 + $0x10] sm:$0xff] }
  0x30   :  { %310 = vmatpush.msrb.mxu2 %v127_v47  ;;  %328 = vmatpush.msrb.mxu3 %v136_v52  ;;  %v96_v13 = vld [vmem:[#allocation5] sm:$0xff]  ;;  %v112_v14 = vld [vmem:[#allocation8 + $0x78] sm:$0xff]  ;;  %v342_v20 = vld [vmem:[%s706_s5] sm:$0xf]  ;;  %s638_s5 = smov [#allocation11]  }
  0x31   :  { %271 = vmatpush.msrb.mxu0 %v121_v49  ;;  %291 = vmatpush.msrb.mxu1 %v122_v50  ;;  %v108_v15 = vld [vmem:[#allocation8 + $0x58] sm:$0xff]  ;;  %v344_v22 = vperm.slane %v342_v20, 0  ;;  %v345_v23 = vperm.slane %v342_v20, 1  ;;  %v346_v33 = vperm.slane %v342_v20, 2  ;;  %v347_v44 = vperm.slane %v342_v20, 3  ;;  %s429_s21 = sshll.u32 %s638_s5, 4  ;;  %s430_s21 = int_to_ptr.vmem [resolvable:$true] %s429_s21 }
  0x32   :  { %311 = vmatpush.msrb.mxu2 %v123_v51  ;;  %329 = vmatpush.msrb.mxu3 %v132_v56  ;;  %v104_v16 = vld [vmem:[#allocation8 + $0x38] sm:$0xff] }
  0x33   :  { %272 = vmatpush.msrb.mxu0 %v117_v53  ;;  %292 = vmatpush.msrb.mxu1 %v118_v54  ;;  %v100_v17 = vld [vmem:[#allocation8 + $0x18] sm:$0xff] }
  0x34   :  { %312 = vmatpush.msrb.mxu2 %v119_v55  ;;  %446 = vmatmul.msk.f32.vlgmr.msra.gmra.mxu0 %vm178_vm0, %v161_v60 }
  0x35   :  { %273 = vmatpush.msrb.mxu0 %v113_v57  ;;  %293 = vmatpush.msrb.mxu1 %v114_v58 }
  0x36   :  { %313 = vmatpush.msrb.mxu2 %v115_v59  ;;  %447 = vmatmul.msk.f32.vlgmr.msra.gmra.mxu1 %vm178_vm0, %v161_v60 }
  0x37   :  { %448 = vmatmul.msk.f32.vlgmr.msra.gmra.mxu2 %vm178_vm0, %v161_v60  ;;  %330 = vmatpush.msrb.mxu3 %v128_v61 }
  0x38   :  { %274 = vmatpush.msrb.mxu0 %v109_v62  ;;  %294 = vmatpush.msrb.mxu1 %v110_v63 }
  0x39   :  { %314 = vmatpush.msrb.mxu2 %v111_v0  ;;  %331 = vmatpush.msrb.mxu3 %v124_v1 }
  0x3a   :  { %275 = vmatpush.msrb.mxu0 %v105_v2  ;;  %295 = vmatpush.msrb.mxu1 %v106_v3  ;;  %v356_v2 = vld [vmem:[#allocation7] sm:$0xff] }
  0x3b   :  { %315 = vmatpush.msrb.mxu2 %v107_v4  ;;  %332 = vmatpush.msrb.mxu3 %v120_v5 }
  0x3c   :  { %276 = vmatpush.msrb.mxu0 %v101_v6  ;;  %296 = vmatpush.msrb.mxu1 %v102_v7 }
  0x3d   :  { %316 = vmatpush.msrb.mxu2 %v103_v8  ;;  %333 = vmatpush.msrb.mxu3 %v116_v9 }
  0x3e   :  { %449 = vmatmul.msk.f32.vlgmr.msra.gmra.mxu3 %vm178_vm0, %v161_v60  ;;  %277 = vmatpush.msrb.mxu0 %v97_v10 }
  0x3f   :  { %297 = vmatpush.msrb.mxu1 %v98_v11  ;;  %317 = vmatpush.msrb.mxu2 %v99_v12 }
  0x40   :  { %278 = vmatmul.f32.vlgmr.msrb.gmra.mxu0 %v96_v13  ;;  %298 = vmatmul.f32.vlgmr.msrb.gmra.mxu1 %v96_v13 }
  0x41   :  { %318 = vmatmul.f32.vlgmr.msrb.gmra.mxu2 %v96_v13  ;;  %334 = vmatpush.msrb.mxu3 %v112_v14 }
  0x43   :  { %335 = vmatpush.msrb.mxu3 %v108_v15 }
  0x45   :  { %336 = vmatpush.msrb.mxu3 %v104_v16 }
  0x47   :  { %337 = vmatpush.msrb.mxu3 %v100_v17 }
  0x48   :  { %338 = vmatmul.f32.vlgmr.msrb.gmra.mxu3 %v96_v13 }
  0xb1   :  { %v199_v18 = vpop.f32.mrf.mxu0 }
  0xb3   :  { %v219_v19 = vpop.f32.mrf.mxu1 }
  0xba   :  { %v239_v21 = vpop.f32.mrf.mxu2 }
  0xbd   :  { %v279_v24 = vpop.f32.mrf.mxu0  ;;  %v299_v25 = vpop.f32.mrf.mxu1 }
  0xbe   :  { %v280_v26 = vadd.f32 %v279_v24, %v199_v18  ;;  %v300_v27 = vadd.f32 %v299_v25, %v219_v19 }
  0xc0   :  { %v352_v28 = vadd.f32 %v344_v22, %v280_v26  ;;  %v353_v29 = vadd.f32 %v345_v23, %v300_v27 }
  0xc1   :  { %v259_v32 = vpop.f32.mrf.mxu3 }
  0xc2   :  { %v450_v30 = vmul.f32 -1.442695, %v352_v28  ;;  %v451_v31 = vmul.f32 -1.442695, %v353_v29 }
  0xc4   :  { %463 = vpow2.f32 %v450_v30  ;;  %v319_v34 = vpop.f32.mrf.mxu2 }
  0xc5   :  { %465 = vpow2.f32 %v451_v31  ;;  %v320_v35 = vadd.f32 %v319_v34, %v239_v21 }
  0xc7   :  { %v354_v36 = vadd.f32 %v346_v33, %v320_v35 }
  0xc9   :  { %v452_v37 = vmul.f32 -1.442695, %v354_v36 }
  0xca   :  { %v464_v38 = vpop.eup %463 }
  0xcb   :  { %v466_v39 = vpop.eup %465  ;;  %v360_v40 = vadd.f32 1.0, %v464_v38  ;;  %467 = vpow2.f32 %v452_v37  ;;  %v339_v42 = vpop.f32.mrf.mxu3 }
  0xcc   :  { %v379_v41 = vadd.f32 1.0, %v466_v39  ;;  %v340_v43 = vadd.f32 %v339_v42, %v259_v32 }
  0xcd   :  { %469 = vrcp.f32 %v360_v40  ;;  %v372_v54 = vand.u32 2147483648, %v360_v40  ;;  %v370_v57 = vand.u32 2147483647, %v360_v40  ;;  %vm366_vm3 = vweird.f32 %v360_v40 }
  0xce   :  { %471 = vrcp.f32 %v379_v41  ;;  %v355_v48 = vadd.f32 %v347_v44, %v340_v43  ;;  %v391_v55 = vand.u32 2147483648, %v379_v41  ;;  %v389_v59 = vand.u32 2147483647, %v379_v41 }
  0xcf   :  { %vm385_vm4 = vweird.f32 %v379_v41  ;;  %v373_v63 = vor.u32 1.1754944e-38, %v372_v54  ;;  %vm371_vm7 = vcmp.eq.f32.partialorder %v370_v57, 8.507059e+37 }
  0xd0   :  { %v392_v1 = vor.u32 1.1754944e-38, %v391_v55  ;;  %vm390_vm8 = vcmp.eq.f32.partialorder %v389_v59, 8.507059e+37 }
  0xd1   :  { %v468_v45 = vpop.eup %467 }
  0xd2   :  { %v398_v46 = vadd.f32 1.0, %v468_v45 }
  0xd3   :  { %v470_v47 = vpop.eup %469 }
  0xd4   :  { %v472_v49 = vpop.eup %471  ;;  %v362_v50 = vmul.f32 %v470_v47, %v360_v40  ;;  %473 = vrcp.f32 %v398_v46  ;;  %vm367_vm1 = vweird.f32 %v470_v47  ;;  %v410_v8 = vand.u32 2147483648, %v398_v46 }
  0xd5   :  { %v381_v51 = vmul.f32 %v472_v49, %v379_v41  ;;  %475 = vtanh.f32 %v355_v48  ;;  %vm386_vm2 = vweird.f32 %v472_v49  ;;  %vm368_vm5 = vmor %vm366_vm3, %vm367_vm1  ;;  %v408_v12 = vand.u32 2147483647, %v398_v46 }
  0xd6   :  { %v363_v52 = vsub.f32 1.0, %v362_v50  ;;  %vm387_vm6 = vmor %vm385_vm4, %vm386_vm2  ;;  %vm404_vm10 = vweird.f32 %v398_v46  ;;  %v411_v16 = vor.u32 1.1754944e-38, %v410_v8 }
  0xd7   :  { %v382_v53 = vsub.f32 1.0, %v381_v51  ;;  %vm409_vm12 = vcmp.eq.f32.partialorder %v408_v12, 8.507059e+37 }
  0xd8   :  { %v364_v56 = vmul.f32 %v470_v47, %v363_v52 }
  0xd9   :  { %v383_v58 = vmul.f32 %v472_v49, %v382_v53 }
  0xda   :  { %v474_v60 = vpop.eup %473  ;;  %v365_v61 = vadd.f32 %v470_v47, %v364_v56 }
  0xdb   :  { %v400_v62 = vmul.f32 %v474_v60, %v398_v46  ;;  %v384_v0 = vadd.f32 %v472_v49, %v383_v58  ;;  %v476_v4 = vpop.eup %475  ;;  %vm405_vm9 = vweird.f32 %v474_v60 }
  0xdc   :  { %v369_v3 = vsel %vm368_vm5, %v470_v47, %v365_v61  ;;  %vm406_vm11 = vmor %vm404_vm10, %vm405_vm9 }
  0xdd   :  { %v401_v5 = vsub.f32 1.0, %v400_v62  ;;  %v374_v6 = vsel %vm371_vm7, %v373_v63, %v369_v3  ;;  %v388_v7 = vsel %vm387_vm6, %v472_v49, %v384_v0 }
  0xde   :  { %v393_v9 = vsel %vm390_vm8, %v392_v1, %v388_v7  ;;  %v418_v10 = vmul.f32 %v476_v4, %v374_v6 }
  0xdf   :  { %v402_v11 = vmul.f32 %v474_v60, %v401_v5  ;;  %v417_v13 = vmul.f32 %v393_v9, %v356_v2 }
  0xe1   :  { %v403_v14 = vadd.f32 %v474_v60, %v402_v11  ;;  %v419_v15 = vadd.f32 %v418_v10, %v417_v13 }
  0xe3   :  { %477 = vtanh.f32 %v419_v15  ;;  %424 = vst [vmem:[#allocation11 + $0x8] sm:$0xff] %v419_v15  ;;  %v407_v17 = vsel %vm406_vm11, %v474_v60, %v403_v14 }
  0xe4   :  { %v412_v18 = vsel %vm409_vm12, %v411_v16, %v407_v17 }
  0xe5   :  { %vm415_vm13 = vcmp.gt.f32.partialorder %v412_v18, 0.4 }
  0xe6   :  { %v416_v20 = vsel %vm415_vm13, %v412_v18, 0.0 }
  0xe9   :  { %v478_v19 = vpop.eup %477 }
  0xea   :  { %v421_v21 = vmul.f32 %v478_v19, %v416_v20 }
  0xec   :  { %422 = vst [vmem:[#allocation11] sm:$0xff] %v421_v21 }
  0xed   :  { %437 = dma.vmem_to_hbm [thread:$0]  %s430_s21, 256, %s432_s24, [#allocation4], %s639_s25, %s639_s25, %s640_s26  }
  0xee   :  { %629 = dma.done.wait [#allocation4], 256  }
  0xef   :  { %630 = vsyncadd [#allocation4], 4294967040 }
  0xf0   :  { %442 = vsyncpa [#allocation3], 1 }
  0xf1   :  { %443 = vsyncpa [#allocation6], 1 }
  0xf2   :  { %444 = vsyncpa [#allocation9], 1 }
  0xf3   :  { %445 = vsyncpa [#allocation4], 1 }

</bundles_post_ra>
